<compile_context>
chip_gen: v5e
topology: v5e:2x2
jax: 0.10.0
libtpu: 0.0.40
codegen_flags: <defaults>
</compile_context>

<pallas_src>
from functools import partial

import jax
import jax.numpy as jnp
from jax.experimental import pallas as pl
from jax.experimental.pallas import tpu as pltpu


def _mha_kernel(qf_ref, kf_ref, vf_ref, wq_ref, wk_ref, wv_ref, wo_ref, o_ref,
                *, batch_block, inv_temperature):
    G = batch_block
    Lq = qf_ref.shape[0] // G
    Lk = kf_ref.shape[0] // G

    Wq = wq_ref[...]      # (d_model, d_k)  pre-transposed in the wrapper
    Wk = wk_ref[...]      # (d_model, d_k)
    Wv = wv_ref[...]      # (d_model, d_v)
    Wo = wo_ref[...]      # (d_v, d_model)  head-folded + pre-transposed in the wrapper

    # Shared projections: one dense (G*L, d_model) @ (d_model, d_k) GEMM each on the MXU,
    # no transposes emitted inside the kernel.
    q = jnp.dot(qf_ref[...], Wq, preferred_element_type=jnp.float32)   # (G*Lq, d_k)
    k = jnp.dot(kf_ref[...], Wk, preferred_element_type=jnp.float32)   # (G*Lk, d_k)
    v = jnp.dot(vf_ref[...], Wv, preferred_element_type=jnp.float32)   # (G*Lk, d_v)

    d_k = q.shape[-1]
    d_v = v.shape[-1]
    qb = q.reshape(G, Lq, d_k)
    kb = k.reshape(G, Lk, d_k)
    vb = v.reshape(G, Lk, d_v)

    # Scaled dot-product attention, batched over the G batch elements in this block.
    scores = jnp.einsum("bqd,bkd->bqk", qb, kb,
                        preferred_element_type=jnp.float32) * inv_temperature
    scores = scores - jnp.max(scores, axis=-1, keepdims=True)
    e = jnp.exp(scores)
    denom = jnp.sum(e, axis=-1, keepdims=True)
    # Exact reciprocal (approx=True EUP path is lower precision than the fp32 reference).
    attn = e * pl.reciprocal(denom, approx=False)
    # TODO(synk): nn.Dropout(0.1) on attn weights is identity in eval mode; training-mode
    # dropout (pltpu.prng_*) is not implemented here.

    head = jnp.einsum("bqk,bkd->bqd", attn, vb,
                      preferred_element_type=jnp.float32)              # (G, Lq, d_v)

    # Output projection against the head-folded W_O (replaces concat([head]*8) @ W_O.T).
    o_ref[...] = jnp.dot(head.reshape(G * Lq, d_v), Wo,
                         preferred_element_type=jnp.float32)           # (G*Lq, d_model)


def multi_head_attention(Q, K, V, Wq, Wk, Wv, Wo, *, n_heads=8, batch_block=None):
    B, Lq, d_model = Q.shape
    _, Lk, _ = K.shape
    d_k = d_model // n_heads
    inv_temperature = 1.0 / (float(d_k) ** 0.5)

    if batch_block is None:
        # Amortize per-grid-step overhead but keep >= 2 grid steps so both TensorCores
        # of a megacore part (v7x) get work.
        batch_block = B // 2 if (B >= 2 and B % 2 == 0) else 1
    G = batch_block
    assert B % G == 0, "batch_block must divide batch"
    num_steps = B // G

    # Host-side (one-time) weight prep: pre-transpose so no in-kernel XLU transposes,
    # and fold the n_heads identical column blocks of W_O into a single (d_model, d_k) block.
    Wq_t = Wq.T                                              # (d_model, d_k)
    Wk_t = Wk.T                                              # (d_model, d_k)
    Wv_t = Wv.T                                              # (d_model, d_v)
    Wo_f = Wo.reshape(d_model, n_heads, d_k).sum(axis=1).T   # (d_v, d_model)

    # Flatten batch*seq so every input DMA and the output store are dense 2D slabs.
    Qf = Q.reshape(B * Lq, d_model)
    Kf = K.reshape(B * Lk, d_model)
    Vf = V.reshape(B * Lk, d_model)

    kernel = partial(_mha_kernel, batch_block=G, inv_temperature=inv_temperature)

    seq_spec = lambda L: pl.BlockSpec((G * L, d_model), lambda b: (b, 0))
    # Weights: whole-array resident in VMEM, not blocked / double-buffered per grid step.
    w_spec = pl.BlockSpec(memory_space=pltpu.MemorySpace.VMEM)

    out_flat = pl.pallas_call(
        kernel,
        out_shape=jax.ShapeDtypeStruct((B * Lq, d_model), jnp.float32),
        grid=(num_steps,),
        in_specs=[seq_spec(Lq), seq_spec(Lk), seq_spec(Lk),
                  w_spec, w_spec, w_spec, w_spec],
        out_specs=seq_spec(Lq),
        compiler_params=pltpu.CompilerParams(dimension_semantics=("parallel",)),
    )(Qf, Kf, Vf, Wq_t, Wk_t, Wv_t, Wo_f)

    return out_flat.reshape(B, Lq, d_model)


def mha_reference(Q, K, V, Wq, Wk, Wv, Wo, *, n_heads=8):
    d_model = Q.shape[-1]
    d_k = d_model // n_heads
    q = Q @ Wq.T
    k = K @ Wk.T
    v = V @ Wv.T
    scores = jnp.einsum("bqd,bkd->bqk", q, k) / (d_k ** 0.5)
    attn = jax.nn.softmax(scores, axis=-1)
    head = jnp.einsum("bqk,bkd->bqd", attn, v)
    x = jnp.concatenate([head] * n_heads, axis=2)
    return x @ Wo.T


if __name__ == "__main__":
    B, L, d_model, n_heads = 2, 8, 128, 8
    d_k = d_model // n_heads

    key = jax.random.PRNGKey(0)
    kq, kk, kv, k1, k2, k3, k4 = jax.random.split(key, 7)

    Q = jax.random.normal(kq, (B, L, d_model), dtype=jnp.float32)
    K = jax.random.normal(kk, (B, L, d_model), dtype=jnp.float32)
    V = jax.random.normal(kv, (B, L, d_model), dtype=jnp.float32)

    # nn.Linear(in, out, bias=False) weights: shape (out_features, in_features)
    scale = 1.0 / (d_model ** 0.5)
    Wq = jax.random.normal(k1, (d_k, d_model), dtype=jnp.float32) * scale
    Wk = jax.random.normal(k2, (d_k, d_model), dtype=jnp.float32) * scale
    Wv = jax.random.normal(k3, (d_k, d_model), dtype=jnp.float32) * scale
    Wo = jax.random.normal(k4, (d_model, n_heads * d_k), dtype=jnp.float32) * scale

    out = multi_head_attention(Q, K, V, Wq, Wk, Wv, Wo, n_heads=n_heads)
    out = jax.block_until_ready(out)

    ref = mha_reference(Q, K, V, Wq, Wk, Wv, Wo, n_heads=n_heads)
    assert out.shape == (B, L, d_model)
    assert jnp.allclose(out, ref, atol=1e-4, rtol=1e-4), "mismatch vs reference"

    print("KERNEL_OK")
</pallas_src>

<mosaic_0001>
module attributes {stable_mosaic.version = 11 : i64} {
  func.func @_mha_kernel(%arg0: i32, %arg1: memref<8x128xf32, #tpu.memory_space<vmem>>, %arg2: memref<8x128xf32, #tpu.memory_space<vmem>>, %arg3: memref<8x128xf32, #tpu.memory_space<vmem>>, %arg4: memref<128x16xf32, #tpu.memory_space<vmem>>, %arg5: memref<128x16xf32, #tpu.memory_space<vmem>>, %arg6: memref<128x16xf32, #tpu.memory_space<vmem>>, %arg7: memref<16x128xf32, #tpu.memory_space<vmem>>, %arg8: memref<8x128xf32, #tpu.memory_space<vmem>>) attributes {dimension_semantics = [#tpu.dimension_semantics<parallel>], iteration_bounds = array<i64: 2>, scalar_prefetch = 0 : i64, scratch_operands = 0 : i64, tpu.core_type = #tpu.core_type<tc>, window_params = [{transform_indices = @transform_0, window_bounds = array<i64: 8, 128>}, {transform_indices = @transform_1, window_bounds = array<i64: 8, 128>}, {transform_indices = @transform_2, window_bounds = array<i64: 8, 128>}, {pipeline_mode = #tpu.pipeline_mode<synchronous>, transform_indices = @transform_3, window_bounds = array<i64: 128, 16>}, {pipeline_mode = #tpu.pipeline_mode<synchronous>, transform_indices = @transform_4, window_bounds = array<i64: 128, 16>}, {pipeline_mode = #tpu.pipeline_mode<synchronous>, transform_indices = @transform_5, window_bounds = array<i64: 128, 16>}, {pipeline_mode = #tpu.pipeline_mode<synchronous>, transform_indices = @transform_6, window_bounds = array<i64: 16, 128>}, {transform_indices = @transform_7, window_bounds = array<i64: 8, 128>}]} {
    %c0 = arith.constant 0 : index
    %c0_0 = arith.constant 0 : index
    %0 = vector.load %arg4[%c0, %c0_0] : memref<128x16xf32, #tpu.memory_space<vmem>>, vector<128x16xf32>
    %c0_1 = arith.constant 0 : index
    %c0_2 = arith.constant 0 : index
    %1 = vector.load %arg5[%c0_1, %c0_2] : memref<128x16xf32, #tpu.memory_space<vmem>>, vector<128x16xf32>
    %c0_3 = arith.constant 0 : index
    %c0_4 = arith.constant 0 : index
    %2 = vector.load %arg6[%c0_3, %c0_4] : memref<128x16xf32, #tpu.memory_space<vmem>>, vector<128x16xf32>
    %c0_5 = arith.constant 0 : index
    %c0_6 = arith.constant 0 : index
    %3 = vector.load %arg7[%c0_5, %c0_6] : memref<16x128xf32, #tpu.memory_space<vmem>>, vector<16x128xf32>
    %c0_7 = arith.constant 0 : index
    %c0_8 = arith.constant 0 : index
    %4 = vector.load %arg1[%c0_7, %c0_8] : memref<8x128xf32, #tpu.memory_space<vmem>>, vector<8x128xf32>
    %cst = arith.constant dense<0.000000e+00> : vector<8x16xf32>
    %5 = tpu.matmul %4, %0, %cst {dimension_numbers = #tpu.dot_dimension_numbers<[1], [0], [0], [1], [0, 0, 1, 1], [], []>} : vector<8x128xf32>, vector<128x16xf32>, vector<8x16xf32> -> vector<8x16xf32>
    %c0_9 = arith.constant 0 : index
    %c0_10 = arith.constant 0 : index
    %6 = vector.load %arg2[%c0_9, %c0_10] : memref<8x128xf32, #tpu.memory_space<vmem>>, vector<8x128xf32>
    %cst_11 = arith.constant dense<0.000000e+00> : vector<8x16xf32>
    %7 = tpu.matmul %6, %1, %cst_11 {dimension_numbers = #tpu.dot_dimension_numbers<[1], [0], [0], [1], [0, 0, 1, 1], [], []>} : vector<8x128xf32>, vector<128x16xf32>, vector<8x16xf32> -> vector<8x16xf32>
    %c0_12 = arith.constant 0 : index
    %c0_13 = arith.constant 0 : index
    %8 = vector.load %arg3[%c0_12, %c0_13] : memref<8x128xf32, #tpu.memory_space<vmem>>, vector<8x128xf32>
    %cst_14 = arith.constant dense<0.000000e+00> : vector<8x16xf32>
    %9 = tpu.matmul %8, %2, %cst_14 {dimension_numbers = #tpu.dot_dimension_numbers<[1], [0], [0], [1], [0, 0, 1, 1], [], []>} : vector<8x128xf32>, vector<128x16xf32>, vector<8x16xf32> -> vector<8x16xf32>
    %10 = vector.shape_cast %5 : vector<8x16xf32> to vector<1x8x16xf32>
    %11 = vector.shape_cast %7 : vector<8x16xf32> to vector<1x8x16xf32>
    %12 = vector.shape_cast %9 : vector<8x16xf32> to vector<1x8x16xf32>
    "tpu.trace_start"() <{level = 10 : i32, message = "bqd,bkd->bqk"}> : () -> ()
    %cst_15 = arith.constant dense<0.000000e+00> : vector<1x8x8xf32>
    %13 = tpu.matmul %10, %11, %cst_15 {dimension_numbers = #tpu.dot_dimension_numbers<[2], [2], [1], [1], [0, 0, 0, 1, 1, 1], [0], [0]>} : vector<1x8x16xf32>, vector<1x8x16xf32>, vector<1x8x8xf32> -> vector<1x8x8xf32>
    "tpu.trace_stop"() : () -> ()
    %cst_16 = arith.constant 2.500000e-01 : f32
    %14 = vector.broadcast %cst_16 : f32 to vector<1x8x8xf32>
    %15 = arith.mulf %13, %14 : vector<1x8x8xf32>
    %cst_17 = arith.constant dense<0xFF800000> : vector<1x8xf32>
    %16 = vector.multi_reduction <maximumf>, %15, %cst_17 [2] : vector<1x8x8xf32> to vector<1x8xf32>
    %17 = vector.shape_cast %16 : vector<1x8xf32> to vector<1x8x1xf32>
    %18 = vector.broadcast %17 : vector<1x8x1xf32> to vector<1x8x8xf32>
    %19 = arith.subf %15, %18 : vector<1x8x8xf32>
    %20 = math.exp %19 : vector<1x8x8xf32>
    %cst_18 = arith.constant dense<0.000000e+00> : vector<1x8xf32>
    %21 = vector.multi_reduction <add>, %20, %cst_18 [2] : vector<1x8x8xf32> to vector<1x8xf32>
    %22 = vector.shape_cast %21 : vector<1x8xf32> to vector<1x8x1xf32>
    %23 = tpu.reciprocal %22 : vector<1x8x1xf32> -> vector<1x8x1xf32>
    %24 = vector.broadcast %23 : vector<1x8x1xf32> to vector<1x8x8xf32>
    %25 = arith.mulf %20, %24 : vector<1x8x8xf32>
    "tpu.trace_start"() <{level = 10 : i32, message = "bqk,bkd->bqd"}> : () -> ()
    %cst_19 = arith.constant dense<0.000000e+00> : vector<1x8x16xf32>
    %26 = tpu.matmul %25, %12, %cst_19 {dimension_numbers = #tpu.dot_dimension_numbers<[2], [1], [1], [2], [0, 0, 0, 1, 1, 2], [0], [0]>} : vector<1x8x8xf32>, vector<1x8x16xf32>, vector<1x8x16xf32> -> vector<1x8x16xf32>
    "tpu.trace_stop"() : () -> ()
    %27 = vector.shape_cast %26 : vector<1x8x16xf32> to vector<8x16xf32>
    %cst_20 = arith.constant dense<0.000000e+00> : vector<8x128xf32>
    %28 = tpu.matmul %27, %3, %cst_20 {dimension_numbers = #tpu.dot_dimension_numbers<[1], [0], [0], [1], [0, 0, 1, 1], [], []>} : vector<8x16xf32>, vector<16x128xf32>, vector<8x128xf32> -> vector<8x128xf32>
    %c0_21 = arith.constant 0 : index
    %c0_22 = arith.constant 0 : index
    %29 = vector.load %arg8[%c0_21, %c0_22] : memref<8x128xf32, #tpu.memory_space<vmem>>, vector<8x128xf32>
    tpu.vector_store %arg8[%c0_21, %c0_22], %28 {strides = array<i32>} : memref<8x128xf32, #tpu.memory_space<vmem>>, vector<8x128xf32>,
    return
  }
  func.func @transform_0(%arg0: i32) -> (i32, i32) {
    %c0_i32 = arith.constant 0 : i32
    %c0_i32_0 = arith.constant 0 : i32
    return %arg0, %c0_i32 : i32, i32
  }
  func.func @transform_1(%arg0: i32) -> (i32, i32) {
    %c0_i32 = arith.constant 0 : i32
    %c0_i32_0 = arith.constant 0 : i32
    return %arg0, %c0_i32 : i32, i32
  }
  func.func @transform_2(%arg0: i32) -> (i32, i32) {
    %c0_i32 = arith.constant 0 : i32
    %c0_i32_0 = arith.constant 0 : i32
    return %arg0, %c0_i32 : i32, i32
  }
  func.func @transform_3(%arg0: i32) -> (i32, i32) {
    %c0_i32 = arith.constant 0 : i32
    %c0_i32_0 = arith.constant 0 : i32
    %c0_i32_1 = arith.constant 0 : i32
    return %c0_i32, %c0_i32_0 : i32, i32
  }
  func.func @transform_4(%arg0: i32) -> (i32, i32) {
    %c0_i32 = arith.constant 0 : i32
    %c0_i32_0 = arith.constant 0 : i32
    %c0_i32_1 = arith.constant 0 : i32
    return %c0_i32, %c0_i32_0 : i32, i32
  }
  func.func @transform_5(%arg0: i32) -> (i32, i32) {
    %c0_i32 = arith.constant 0 : i32
    %c0_i32_0 = arith.constant 0 : i32
    %c0_i32_1 = arith.constant 0 : i32
    return %c0_i32, %c0_i32_0 : i32, i32
  }
  func.func @transform_6(%arg0: i32) -> (i32, i32) {
    %c0_i32 = arith.constant 0 : i32
    %c0_i32_0 = arith.constant 0 : i32
    %c0_i32_1 = arith.constant 0 : i32
    return %c0_i32, %c0_i32_0 : i32, i32
  }
  func.func @transform_7(%arg0: i32) -> (i32, i32) {
    %c0_i32 = arith.constant 0 : i32
    %c0_i32_0 = arith.constant 0 : i32
    return %arg0, %c0_i32 : i32, i32
  }
}

</mosaic_0001>

<bundles_post_ra>
// kernel: tpu_custom_call.1
= control target key start
LH: loop header
LB: loop body
LE: loop exit
PB: predicated region body
PF: predicated region fallthrough
CT: control target
= control target key end

     0   :  { %12 = vsyncpa [#allocation3], 0  ;;  %s1035_s0 = inlined_call_operand.vmem [shape: f32[16,128], index: 0, kind: input, shape index: {}]   ;;  %s1036_s1 = inlined_call_operand.vmem [shape: f32[16,128], index: 1, kind: input, shape index: {}]   ;;  %s1037_s2 = inlined_call_operand.vmem [shape: f32[16,128], index: 2, kind: input, shape index: {}]   ;;  %s1038_s3 = inlined_call_operand.vmem [shape: f32[128,16], index: 3, kind: input, shape index: {}]   ;;  %s1039_s4 = inlined_call_operand.vmem [shape: f32[128,16], index: 4, kind: input, shape index: {}]   ;;  %s1040_s5 = inlined_call_operand.vmem [shape: f32[128,16], index: 5, kind: input, shape index: {}]   ;;  %s1041_s6 = inlined_call_operand.vmem [shape: f32[16,128], index: 6, kind: input, shape index: {}]   ;;  %s1042_s7 = inlined_call_operand.hbm [shape: f32[16,128], index: 7, kind: output, shape index: {}]  }
   0x1   :  { %14 = vsyncpa [#allocation3 + $0x1], 0  ;;  %s783_s24 = smov 0   ;;  %s785_s25 = smov 0  }
   0x2   :  { %s787_s26 = smov 0   ;;  %s789_s27 = smov 0  }
   0x3 LB: > { %s804_s28 = sadd.s32 4294967295, %s741_s27   ;;  %s620_s29 = sadd.s32 4294967294, %s741_s27   ;;  %s741_s27 = sphi %s789_s27, %s1048_s27   ;;  %s737_s26 = sphi %s787_s26, %s1047_s26   ;;  %s733_s25 = sphi %s785_s25, %s1046_s25   ;;  %s729_s24 = sphi %s783_s24, %s1045_s24  }
   0x4   : > { %s808_s30 = sadd.s32 1, %s741_s27   ;;  %s189_s8 = sadd.s32 1, %s737_s26 }
   0x5   : > { %s186_s9 = ssub.s32 %s741_s27, %s808_s30  ;;  %p199_p0 = scmp.ne.s32.totalorder %s737_s26, %s733_s25 }
   0x6   : > { %p187_p1 = scmp.eq.s32.totalorder %s186_s9, 0  ;;  %p200_p2 = scmp.eq.s32.totalorder %s804_s28, 1 }
   0x7   : > { %p205_p3 = scmp.ne.s32.totalorder %s733_s25, %s729_s24  ;;  %p206_p4 = scmp.eq.s32.totalorder %s620_s29, 1 }
   0x8   : > { %s819_s10 = scalar_select %p187_p1, %s737_s26, %s189_s8  }
   0x9   : > { %p821_p5 = por %p200_p2, %p199_p0  ;;  %p825_p6 = por %p206_p4, %p205_p3 }
   0xa   : > { %p623_p7 = scmp.ge.s32.totalorder %s741_s27, 1  ;;  %p257_p8 = scmp.lt.s32.totalorder %s741_s27, 3 }
   0xc   : > { %p258_p9 = pnand %p623_p7, %p257_p8 }
   0xd   : > { %p296_p10 = scmp.lt.s32.totalorder (!%p258_p9), %s804_s28, 1  ;;  %s293_s16 = sand.u32 (!%p258_p9), 1, %s733_s25  }
   0xe   : > { %261 = sbr.rel (%p258_p9) target bundleno = 845 (0x34d), region = 48  ;;  %s624_s17 = sshll.u32 (!%p258_p9), %s293_s16, 3 }
   0xf   : > { %s633_s18 = sshll.u32 (!%p258_p9), %s804_s28, 3  ;;  %s699_s14 = scalar_lea.hbm (!%p258_p9), %s1042_s7, 16 }
  0x10   : > { %s532_s20 = scalar_lea.hbm (!%p258_p9), %s1042_s7, %s633_s18 }
  0x11   : > { %s536_s23 = sshll.u32 (!%p258_p9), %s532_s20, 4  ;;  %s537_s23 = int_to_ptr.hbm [resolvable:$true] %s536_s23 }
  0x13   : > { %v339_v0 = vld [vmem:[%s1039_s4 + $0x78] sm:$0xff]  ;;  %v338_v1 = vld [vmem:[%s1039_s4 + $0x70] sm:$0xff]  ;;  %v337_v4 = vld [vmem:[%s1039_s4 + $0x68] sm:$0xff]  ;;  %s297_s15 = scalar_select %p296_p10, %s804_s28, 1  ;;  %vm421_vm0 = vcmask 130048   ;;  %vm449_vm1 = vcmask 64512  }
  0x14   : > { %v323_v2 = vld [vmem:[%s1038_s3 + $0x78] sm:$0xff]  ;;  %380 = vmatpush.msra.mxu1 %v339_v0  ;;  %v322_v3 = vld [vmem:[%s1038_s3 + $0x70] sm:$0xff]  ;;  %v321_v5 = vld [vmem:[%s1038_s3 + $0x68] sm:$0xff] }
  0x15   : > { %359 = vmatpush.msra.mxu0 %v323_v2  ;;  %v336_v6 = vld [vmem:[%s1039_s4 + $0x60] sm:$0xff]  ;;  %v335_v8 = vld [vmem:[%s1039_s4 + $0x58] sm:$0xff]  ;;  %v334_v10 = vld [vmem:[%s1039_s4 + $0x50] sm:$0xff]  ;;  %s911_s29 = sshll.u32 %s297_s15, 3 }
  0x16   : > { %381 = vmatpush.msra.mxu1 %v338_v1  ;;  %v320_v7 = vld [vmem:[%s1038_s3 + $0x60] sm:$0xff]  ;;  %v319_v9 = vld [vmem:[%s1038_s3 + $0x58] sm:$0xff]  ;;  %v318_v11 = vld [vmem:[%s1038_s3 + $0x50] sm:$0xff]  ;;  %s303_s21 = scalar_lea.vmem %s1036_s1, %s911_s29  ;;  %s299_s8 = scalar_lea.vmem %s1035_s0, %s911_s29 }
  0x17   : > { %360 = vmatpush.msra.mxu0 %v322_v3  ;;  %v333_v12 = vld [vmem:[%s1039_s4 + $0x48] sm:$0xff]  ;;  %v332_v14 = vld [vmem:[%s1039_s4 + $0x40] sm:$0xff]  ;;  %v331_v16 = vld [vmem:[%s1039_s4 + $0x38] sm:$0xff]  ;;  %s307_s22 = scalar_lea.vmem %s1037_s2, %s911_s29  ;;  %s693_s29 = sshra.s32 %s537_s23, 4  ;;  %s694_s29 = int_to_ptr.hbm [resolvable:$true] %s693_s29 }
  0x18   : > { %382 = vmatpush.msra.mxu1 %v337_v4  ;;  %v317_v13 = vld [vmem:[%s1038_s3 + $0x48] sm:$0xff]  ;;  %v316_v15 = vld [vmem:[%s1038_s3 + $0x40] sm:$0xff]  ;;  %v315_v17 = vld [vmem:[%s1038_s3 + $0x38] sm:$0xff]  ;;  %s695_s9 = scalar_lea.hbm %s694_s29, 8  ;;  %p700_p0 = scmp.lt.s32.totalorder %s694_s29, %s1042_s7 }
  0x19   : > { %361 = vmatpush.msra.mxu0 %v321_v5  ;;  %v330_v18 = vld [vmem:[%s1039_s4 + $0x30] sm:$0xff]  ;;  %v329_v20 = vld [vmem:[%s1039_s4 + $0x28] sm:$0xff]  ;;  %v328_v22 = vld [vmem:[%s1039_s4 + $0x20] sm:$0xff]  ;;  %p696_p11 = scmp.ne.s32.totalorder %s694_s29, %s695_s9  ;;  %p701_p1 = scmp.lt.s32.totalorder %s699_s14, %s695_s9 }
  0x1a   : > { %383 = vmatpush.msra.mxu1 %v336_v6  ;;  %v314_v19 = vld [vmem:[%s1038_s3 + $0x30] sm:$0xff]  ;;  %v313_v21 = vld [vmem:[%s1038_s3 + $0x28] sm:$0xff]  ;;  %v312_v23 = vld [vmem:[%s1038_s3 + $0x20] sm:$0xff] }
  0x1b   : > { %362 = vmatpush.msra.mxu0 %v320_v7  ;;  %v327_v24 = vld [vmem:[%s1039_s4 + $0x18] sm:$0xff]  ;;  %v326_v26 = vld [vmem:[%s1039_s4 + $0x10] sm:$0xff]  ;;  %v325_v28 = vld [vmem:[%s1039_s4 + $0x8] sm:$0xff]  ;;  %p697_p12 = pnand %p696_p11, %p821_p5  ;;  %p702_p2 = por %p701_p1, %p700_p0 }
  0x1c   : > { %384 = vmatpush.msra.mxu1 %v335_v8  ;;  %v311_v25 = vld [vmem:[%s1038_s3 + $0x18] sm:$0xff]  ;;  %v310_v27 = vld [vmem:[%s1038_s3 + $0x10] sm:$0xff]  ;;  %v309_v29 = vld [vmem:[%s1038_s3 + $0x8] sm:$0xff] }
  0x1d   : > { %363 = vmatpush.msra.mxu0 %v319_v9  ;;  %v324_v30 = vld [vmem:[%s1039_s4] sm:$0xff]  ;;  %v355_v36 = vld [vmem:[%s1040_s5 + $0x78] sm:$0xff]  ;;  %v354_v37 = vld [vmem:[%s1040_s5 + $0x70] sm:$0xff]  ;;  %p698_p13 = pneg %p697_p12 }
  0x1e   : > { %385 = vmatpush.msra.mxu1 %v334_v10  ;;  %v308_v31 = vld [vmem:[%s1038_s3] sm:$0xff]  ;;  %401 = vmatpush.msra.mxu2 %v355_v36  ;;  %v353_v38 = vld [vmem:[%s1040_s5 + $0x68] sm:$0xff]  ;;  %v351_v40 = vld [vmem:[%s1040_s5 + $0x58] sm:$0xff] }
  0x1f   : > { %364 = vmatpush.msra.mxu0 %v318_v11  ;;  %v379_v32 = vld [vmem:[%s303_s21] sm:$0xff]  ;;  %v350_v41 = vld [vmem:[%s1040_s5 + $0x50] sm:$0xff]  ;;  %v349_v42 = vld [vmem:[%s1040_s5 + $0x48] sm:$0xff]  ;;  %s295_s21 = scalar_lea.vmem [#allocation2], %s624_s17  ;;  %p703_p3 = pnand %p702_p2, %p698_p13 }
  0x20   : > { %386 = vmatpush.msra.mxu1 %v333_v12  ;;  %v358_v33 = vld [vmem:[%s299_s8] sm:$0xff]  ;;  %402 = vmatpush.msra.mxu2 %v354_v37  ;;  %v347_v44 = vld [vmem:[%s1040_s5 + $0x38] sm:$0xff]  ;;  %v346_v45 = vld [vmem:[%s1040_s5 + $0x30] sm:$0xff]  ;;  %s522_s8 = scalar_lea.sflag [#allocation3], %s293_s16 }
  0x21   : > { %365 = vmatpush.msra.mxu0 %v317_v13  ;;  %v352_v39 = vld [vmem:[%s1040_s5 + $0x60] sm:$0xff]  ;;  %v345_v46 = vld [vmem:[%s1040_s5 + $0x28] sm:$0xff]  ;;  %v343_v51 = vld [vmem:[%s1040_s5 + $0x18] sm:$0xff] }
  0x22   : > { %387 = vmatpush.msra.mxu1 %v332_v14  ;;  %403 = vmatpush.msra.mxu2 %v353_v38  ;;  %v348_v43 = vld [vmem:[%s1040_s5 + $0x40] sm:$0xff]  ;;  %v342_v52 = vld [vmem:[%s1040_s5 + $0x10] sm:$0xff]  ;;  %v341_v53 = vld [vmem:[%s1040_s5 + $0x8] sm:$0xff] }
  0x23   : > { %366 = vmatpush.msra.mxu0 %v316_v15  ;;  %v344_v47 = vld [vmem:[%s1040_s5 + $0x20] sm:$0xff]  ;;  %v357_v62 = vld [vmem:[%s1041_s6 + $0x8] sm:$0xff] }
  0x24   : > { %388 = vmatpush.msra.mxu1 %v331_v16  ;;  %404 = vmatpush.msra.mxu2 %v352_v39  ;;  %v340_v54 = vld [vmem:[%s1040_s5] sm:$0xff] }
  0x25   : > { %367 = vmatpush.msra.mxu0 %v315_v17  ;;  %v400_v55 = vld [vmem:[%s307_s22] sm:$0xff]  ;;  %s534_s22 = sshll.u32 %s295_s21, 4  ;;  %s535_s22 = int_to_ptr.vmem [resolvable:$true] %s534_s22 }
  0x26   : > { %389 = vmatpush.msra.mxu1 %v330_v18  ;;  %405 = vmatpush.msra.mxu2 %v351_v40  ;;  %v356_v63 = vld [vmem:[%s1041_s6] sm:$0xff] }
  0x27   : > { %368 = vmatpush.msra.mxu0 %v314_v19 }
  0x28   : > { %390 = vmatpush.msra.mxu1 %v329_v20  ;;  %406 = vmatpush.msra.mxu2 %v350_v41 }
  0x29   : > { %369 = vmatpush.msra.mxu0 %v313_v21 }
  0x2a   : > { %391 = vmatpush.msra.mxu1 %v328_v22  ;;  %407 = vmatpush.msra.mxu2 %v349_v42 }
  0x2b   : > { %370 = vmatpush.msra.mxu0 %v312_v23 }
  0x2c   : > { %392 = vmatpush.msra.mxu1 %v327_v24  ;;  %408 = vmatpush.msra.mxu2 %v348_v43 }
  0x2d   : > { %371 = vmatpush.msra.mxu0 %v311_v25 }
  0x2e   : > { %393 = vmatpush.msra.mxu1 %v326_v26  ;;  %409 = vmatpush.msra.mxu2 %v347_v44 }
  0x2f   : > { %372 = vmatpush.msra.mxu0 %v310_v27 }
  0x30   : > { %394 = vmatpush.msra.mxu1 %v325_v28  ;;  %410 = vmatpush.msra.mxu2 %v346_v45 }
  0x31   : > { %373 = vmatpush.msra.mxu0 %v309_v29 }
  0x32   : > { %395 = vmatpush.msra.mxu1 %v324_v30  ;;  %411 = vmatpush.msra.mxu2 %v345_v46 }
  0x33   : > { %374 = vmatpush.msra.mxu0 %v308_v31  ;;  %396 = vmatmul.f32.vlgmr.msra.gmra.mxu1 %v379_v32 }
  0x34   : > { %375 = vmatmul.f32.vlgmr.msra.gmra.mxu0 %v358_v33  ;;  %412 = vmatpush.msra.mxu2 %v344_v47 }
  0x36   : > { %413 = vmatpush.msra.mxu2 %v343_v51 }
  0x38   : > { %414 = vmatpush.msra.mxu2 %v342_v52 }
  0x3a   : > { %415 = vmatpush.msra.mxu2 %v341_v53 }
  0x3c   : > { %416 = vmatpush.msra.mxu2 %v340_v54 }
  0x3d   : > { %417 = vmatmul.f32.vlgmr.msra.gmra.mxu2 %v400_v55 }
  0xb0   : > { %v397_v34 = vpop.f32.mrf.mxu1 }
  0xb1   : > { %628 = vmatpush.xpose.msk.msra.mxu3 %vm421_vm0, %v397_v34  ;;  %v376_v35 = vpop.f32.mrf.mxu0 }
  0xb4   : > { %629 = vmatmul.msk.f32.vlgmr.msra.gmra.mxu3 %vm421_vm0, %v376_v35 }
  0xc0   : > { %v418_v61 = vpop.f32.mrf.mxu2 }
  0xc1   : > { %492 = vmatpush.msrb.mxu3 %v418_v61 }
  0xc3   : > { %514 = vmatpush.msra.mxu3 %v357_v62 }
  0xc5   : > { %515 = vmatpush.msra.mxu3 %v356_v63 }
 0x137   : > { %v445_v48 = vpop.f32.mrf.mxu3 }
 0x138   : > { %v448_v49 = vmul.f32 0.25, %v445_v48 }
 0x13a   : > { %v450_v50 = vsel %vm449_vm1, %v448_v49, -inf }
 0x13b   : > { %451 = vmax.xlane.f32.xlu0 %v450_v50 }
 0x1ae   : > { %v452_v56 = vpop.xlane.xlu0 %451 }
 0x1af   : > { %v453_v57 = vsub.f32 %v448_v49, %v452_v56 }
 0x1b1   : > { %v454_v58 = vmul.f32 1.442695, %v453_v57 }
 0x1b3   : > { %675 = vpow2.f32 %v454_v58 }
 0x1b9   : > { %v676_v59 = vpop.eup %675 }
 0x1ba   : > { %v456_v60 = vsel %vm449_vm1, %v676_v59, 0.0 }
 0x1bb   : > { %457 = vadd.xlane.f32.xlu0 %v456_v60 }
 0x22e   : > { %v458_v0 = vpop.xlane.xlu0 %457 }
 0x22f   : > { %677 = vrcp.f32 %v458_v0  ;;  %v470_v4 = vand.u32 2147483648, %v458_v0  ;;  %v468_v6 = vand.u32 2147483647, %v458_v0  ;;  %vm464_vm3 = vweird.f32 %v458_v0 }
 0x231   : > { %v471_v8 = vor.u32 1.1754944e-38, %v470_v4  ;;  %vm469_vm5 = vcmp.eq.f32.partialorder %v468_v6, 8.507059e+37 }
 0x235   : > { %v678_v1 = vpop.eup %677 }
 0x236   : > { %v460_v2 = vmul.f32 %v678_v1, %v458_v0  ;;  %vm465_vm2 = vweird.f32 %v678_v1 }
 0x237   : > { %vm466_vm4 = vmor %vm464_vm3, %vm465_vm2 }
 0x238   : > { %v461_v3 = vsub.f32 1.0, %v460_v2 }
 0x23a   : > { %v462_v5 = vmul.f32 %v678_v1, %v461_v3 }
 0x23c   : > { %v463_v7 = vadd.f32 %v678_v1, %v462_v5 }
 0x23e   : > { %v467_v9 = vsel %vm466_vm4, %v678_v1, %v463_v7 }
 0x23f   : > { %v472_v10 = vsel %vm469_vm5, %v471_v8, %v467_v9 }
 0x240   : > { %v473_v11 = vmul.f32 %v676_v59, %v472_v10 }
 0x242   : > { %630 = vmatmul.msk.f32.vlgmr.msrb.gmra.mxu3 %vm449_vm1, %v473_v11 }
 0x2c5   : > { %v494_v12 = vpop.f32.mrf.mxu3 }
 0x2c6   : > { %631 = vmatmul.msk.f32.vlgmr.msra.gmra.mxu3 %vm421_vm0, %v494_v12 }
 0x349   : > { %v517_v13 = vpop.f32.mrf.mxu3 }
 0x34a   : > { %520 = vst [vmem:[%s295_s21] sm:$0xff] %v517_v13 }
 0x34b   : > { %706 = shalt.err (!%p703_p3)
}
 0x34c   : > { %636 = dma.vmem_to_hbm [thread:$0]  (%p821_p5), %s535_s22, 128, %s537_s23, %s522_s8  }
 0x34d PF: > { %p642_p4 = scmp.ge.s32.totalorder %s741_s27, 2  ;;  %s548_s16 = sand.u32 1, %s729_s24  }
 0x34e   : > { %s549_s19 = scalar_lea.sflag [#allocation3], %s548_s16 }
 0x34f   : > { %p639_p7 = pnand %p642_p4, %p825_p6 }
 0x351   : > { %p640_p8 = pneg %p639_p7 }
 0x353   : > { %724 = dma.done.wait (%p640_p8), %s549_s19, 128  }
 0x354   : > { %726 = vsyncadd (%p640_p8), %s549_s19, 4294967168  ;;  %p17_p9 = scmp.ge.s32.totalorder %s808_s30, 4   ;;  %s1045_s24 = smov %s733_s25 }
 0x355   : > { %s1046_s25 = smov %s737_s26  ;;  %s1047_s26 = smov %s819_s10 }
 0x356   : > { %s1048_s27 = smov %s808_s30  ;;  %19 = sbr.rel (!%p17_p9) target bundleno = 3 (0x3), region = 89 }
 0x35b   :  { %555 = vsyncpa [#allocation3], 1 }
 0x35c   :  { %557 = vsyncpa [#allocation3 + $0x1], 1 }

</bundles_post_ra>
